<compile_context>
chip_gen: v7x
topology: tpu7x:2x2x1
jax: 0.10.0
libtpu: 0.0.40
codegen_flags: <defaults>
</compile_context>

<pallas_src>
import functools
import math

import jax
import jax.numpy as jnp
from jax.experimental import pallas as pl
from jax.experimental.pallas import tpu as pltpu


def _round_up(v, m):
    return (v + m - 1) // m * m


def _vmem_cap_bytes():
    # Generation-aware cap: ~3/4 of physical VMEM (≈48 MiB on v7x's 64 MiB,
    # ≈96 MiB on v5e/v6e's 128 MiB). Falls back to a conservative 48 MiB.
    try:
        cap = int(pltpu.get_tpu_info().vmem_capacity_bytes)
    except Exception:
        cap = 64 << 20
    return min(cap * 3 // 4, 96 << 20)


def _gated_conv_kernel(x_ref, w_ref, b_ref, mask_ref, out_ref, *,
                       c_out_p, kh, kw, wp, l_pad, dilation, inv_n):
    # x_ref:    (1, C_in, S_pad)          bf16  zero-padded sample, flat spatial
    # w_ref:    (kh*kw, 2*C_out_p, C_in)  bf16  fused conv+mask taps
    # b_ref:    (2*C_out_p, 1)            f32   fused bias
    # mask_ref: (1, l_pad)                f32   1.0 where (h < Ho and w < Wo)
    # out_ref:  (1, C_out_p, l_pad)       out dtype
    x = x_ref[0]                                     # (C_in, S_pad)

    # Direct conv: kh*kw shifted-slice matmuls into one f32 accumulator.
    acc = jnp.zeros((2 * c_out_p, l_pad), jnp.float32)
    for di in range(kh):                             # statically unrolled
        for dj in range(kw):
            off = dilation * (di * wp + dj)          # flat offset of this tap
            acc = acc + jnp.dot(w_ref[di * kw + dj], x[:, off:off + l_pad],
                                preferred_element_type=jnp.float32)
    acc = acc + b_ref[...]                           # lane broadcast of bias

    xb = acc[:c_out_p]                               # conv branch (C_out_p, L)
    mb = acc[c_out_p:]                               # mask branch (C_out_p, L)

    # ELU (alpha=1); clamp exp argument so the untaken branch can't overflow.
    elu_x = jnp.where(xb > 0, xb, jnp.exp(jnp.minimum(xb, 0.0)) - 1.0)
    # sigmoid via tanh: one EUP push instead of exp + reciprocal.
    gate = 0.5 * jnp.tanh(0.5 * mb) + 0.5
    y = elu_x * gate * mask_ref[...]                 # zero padded/garbage cols

    # Fused one-pass instance-norm stats (per channel, valid columns only).
    s1 = jnp.sum(y, axis=1, keepdims=True) * inv_n           # mean
    s2 = jnp.sum(y * y, axis=1, keepdims=True) * inv_n       # E[y^2]
    var = jnp.maximum(s2 - s1 * s1, 0.0)
    out_ref[0] = ((y - s1) * jax.lax.rsqrt(var + 1e-5)).astype(out_ref.dtype)


def gated_conv(x, w_conv, b_conv, w_mask, b_mask, *, stride=1, padding=0,
               dilation=1, out_dtype=jnp.float32):
    """x: (N, C_in, H, W) NCHW. weights: (C_out, C_in, KH, KW). Returns NCHW."""
    assert stride == 1, "TODO(synk): stride > 1 not implemented in direct-conv path"
    n, c_in, h, w = x.shape
    c_out, _, kh, kw = w_conv.shape
    hp, wp = h + 2 * padding, w + 2 * padding
    ho = hp - dilation * (kh - 1)
    wo = wp - dilation * (kw - 1)
    assert ho > 0 and wo > 0

    c_out_p = _round_up(c_out, 8)            # sublane-aligned conv/mask split
    l_pad = _round_up(ho * wp, 128)          # lane-dense output extent
    max_off = dilation * ((kh - 1) * wp + (kw - 1))
    s_pad = _round_up(max(hp * wp, max_off + l_pad), 128)

    # bf16 BEFORE materializing the padded/flattened input (halves HBM traffic).
    xb16 = x.astype(jnp.bfloat16)
    xp = jnp.pad(xb16, ((0, 0), (0, 0), (padding, padding), (padding, padding)))
    xf = xp.reshape(n, c_in, hp * wp)
    xf = jnp.pad(xf, ((0, 0), (0, 0), (0, s_pad - hp * wp)))

    # Fused (conv ; mask) weights: one (2*C_out_p, C_in) tap per (di, dj).
    def taps(wt):
        t = jnp.transpose(wt.reshape(c_out, c_in, kh * kw), (2, 0, 1))
        return jnp.pad(t, ((0, 0), (0, c_out_p - c_out), (0, 0)))
    wf = jnp.concatenate([taps(w_conv), taps(w_mask)], axis=1).astype(jnp.bfloat16)
    bf = jnp.concatenate([
        jnp.pad(b_conv, (0, c_out_p - c_out)),
        jnp.pad(b_mask, (0, c_out_p - c_out)),
    ]).reshape(2 * c_out_p, 1).astype(jnp.float32)

    # Lane-validity mask over the flat coordinate f = h*Wp + w.
    f = jnp.arange(l_pad)
    valid = ((f % wp) < wo) & ((f // wp) < ho)
    vmask = valid.astype(jnp.float32).reshape(1, l_pad)

    kernel = functools.partial(
        _gated_conv_kernel, c_out_p=c_out_p, kh=kh, kw=kw, wp=wp,
        l_pad=l_pad, dilation=dilation, inv_n=1.0 / float(ho * wo))

    # VMEM budget from actual block bytes (x2 buffering) + accumulator headroom.
    out_isz = jnp.dtype(out_dtype).itemsize
    blk = (2 * (c_in * s_pad * 2 + c_out_p * l_pad * out_isz)
           + 2 * (kh * kw * 2 * c_out_p * c_in * 2 + 2 * c_out_p * 4 + l_pad * 4)
           + 8 * (2 * c_out_p * l_pad * 4))
    vmem_limit = int(min(_vmem_cap_bytes(), max(blk + (8 << 20), 32 << 20)))

    out = pl.pallas_call(
        kernel,
        out_shape=jax.ShapeDtypeStruct((n, c_out_p, l_pad), out_dtype),
        grid_spec=pltpu.PrefetchScalarGridSpec(
            num_scalar_prefetch=0,
            grid=(n,),
            in_specs=[
                pl.BlockSpec((1, c_in, s_pad), lambda b: (b, 0, 0)),
                pl.BlockSpec((kh * kw, 2 * c_out_p, c_in), lambda b: (0, 0, 0)),
                pl.BlockSpec((2 * c_out_p, 1), lambda b: (0, 0)),
                pl.BlockSpec((1, l_pad), lambda b: (0, 0)),
            ],
            out_specs=pl.BlockSpec((1, c_out_p, l_pad), lambda b: (b, 0, 0)),
        ),
        compiler_params=pltpu.CompilerParams(
            dimension_semantics=("parallel",),
            vmem_limit_bytes=vmem_limit,
        ),
    )(xf, wf, bf, vmask)

    # (N, C_out_p, L_pad) -> NCHW: drop channel padding, unflatten, drop the
    # Wp-Wo garbage columns (pure slice/reshape; no HBM transpose round trip).
    out = out[:, :c_out, :ho * wp].reshape(n, c_out, ho, wp)[:, :, :, :wo]
    return out


def _reference(x, w_conv, b_conv, w_mask, b_mask, stride, padding, dilation=1):
    dn = ("NCHW", "OIHW", "NCHW")

    def conv(w, b):
        o = jax.lax.conv_general_dilated(
            x, w, (stride, stride),
            [(padding, padding), (padding, padding)],
            rhs_dilation=(dilation, dilation),
            dimension_numbers=dn)
        return o + b[None, :, None, None]

    xo = conv(w_conv, b_conv)
    mo = conv(w_mask, b_mask)
    y = jax.nn.elu(xo) * jax.nn.sigmoid(mo)
    mean = y.mean(axis=(2, 3), keepdims=True)
    var = ((y - mean) ** 2).mean(axis=(2, 3), keepdims=True)
    return (y - mean) / jnp.sqrt(var + 1e-5)


if __name__ == "__main__":
    N, C_IN, H, W = 2, 4, 16, 16
    C_OUT, KH, KW = 8, 3, 3
    STRIDE, PAD = 1, 1

    key = jax.random.PRNGKey(0)
    kx, kwc, kbc, kwm, kbm = jax.random.split(key, 5)

    x = jax.random.normal(kx, (N, C_IN, H, W), jnp.float32)
    bound = 1.0 / math.sqrt(C_IN * KH * KW)  # torch Conv2d default init bound
    w_conv = jax.random.uniform(kwc, (C_OUT, C_IN, KH, KW), jnp.float32, -bound, bound)
    b_conv = jax.random.uniform(kbc, (C_OUT,), jnp.float32, -bound, bound)
    w_mask = jax.random.uniform(kwm, (C_OUT, C_IN, KH, KW), jnp.float32, -bound, bound)
    b_mask = jax.random.uniform(kbm, (C_OUT,), jnp.float32, -bound, bound)

    out = gated_conv(x, w_conv, b_conv, w_mask, b_mask, stride=STRIDE, padding=PAD)
    out = jax.block_until_ready(out)

    # Reference gets the same bf16-rounded inputs (kernel is bf16-in /
    # f32-accumulate), so remaining deltas are accumulation order, the
    # tanh-form sigmoid, and E[y^2]-mean^2 variance.
    x_r = x.astype(jnp.bfloat16).astype(jnp.float32)
    wc_r = w_conv.astype(jnp.bfloat16).astype(jnp.float32)
    wm_r = w_mask.astype(jnp.bfloat16).astype(jnp.float32)
    ref = _reference(x_r, wc_r, b_conv, wm_r, b_mask, STRIDE, PAD)

    assert out.shape == (N, C_OUT, H, W), out.shape
    assert bool(jnp.all(jnp.isfinite(out)))
    max_err = float(jnp.max(jnp.abs(out - ref)))
    assert jnp.allclose(out, ref, atol=5e-3, rtol=5e-3), max_err

    print("KERNEL_OK")
</pallas_src>

<mosaic_0001>
module attributes {stable_mosaic.version = 11 : i64} {
  func.func @_gated_conv_kernel(%arg0: i32, %arg1: memref<1x4x512xbf16, #tpu.memory_space<vmem>>, %arg2: memref<9x16x4xbf16, #tpu.memory_space<vmem>>, %arg3: memref<16x1xf32, #tpu.memory_space<vmem>>, %arg4: memref<1x384xf32, #tpu.memory_space<vmem>>, %arg5: memref<1x8x384xf32, #tpu.memory_space<vmem>>) attributes {dimension_semantics = [#tpu.dimension_semantics<parallel>], iteration_bounds = array<i64: 2>, scalar_prefetch = 0 : i64, scratch_operands = 0 : i64, tpu.core_type = #tpu.core_type<tc>, window_params = [{transform_indices = @transform_0, window_bounds = array<i64: 1, 4, 512>}, {pipeline_mode = #tpu.pipeline_mode<synchronous>, transform_indices = @transform_1, window_bounds = array<i64: 9, 16, 4>}, {pipeline_mode = #tpu.pipeline_mode<synchronous>, transform_indices = @transform_2, window_bounds = array<i64: 16, 1>}, {pipeline_mode = #tpu.pipeline_mode<synchronous>, transform_indices = @transform_3, window_bounds = array<i64: 1, 384>}, {transform_indices = @transform_4, window_bounds = array<i64: 1, 8, 384>}]} {
    %c0 = arith.constant 0 : index
    %c0_0 = arith.constant 0 : index
    %c0_1 = arith.constant 0 : index
    %0 = vector.load %arg1[%c0, %c0_0, %c0_1] : memref<1x4x512xbf16, #tpu.memory_space<vmem>>, vector<1x4x512xbf16>
    %1 = vector.shape_cast %0 : vector<1x4x512xbf16> to vector<4x512xbf16>
    %cst = arith.constant 0.000000e+00 : f32
    %2 = vector.broadcast %cst : f32 to vector<16x384xf32>
    %c0_2 = arith.constant 0 : index
    %c0_3 = arith.constant 0 : index
    %c0_4 = arith.constant 0 : index
    %3 = vector.load %arg2[%c0_2, %c0_3, %c0_4] : memref<9x16x4xbf16, #tpu.memory_space<vmem>>, vector<1x16x4xbf16>
    %4 = vector.shape_cast %3 : vector<1x16x4xbf16> to vector<16x4xbf16>
    %5 = vector.extract_strided_slice %1 {offsets = [0, 0], sizes = [4, 384], strides = [1, 1]} : vector<4x512xbf16> to vector<4x384xbf16>
    %cst_5 = arith.constant dense<0.000000e+00> : vector<16x384xf32>
    %6 = tpu.matmul %4, %5, %cst_5 {dimension_numbers = #tpu.dot_dimension_numbers<[1], [0], [0], [1], [0, 0, 1, 1], [], []>} : vector<16x4xbf16>, vector<4x384xbf16>, vector<16x384xf32> -> vector<16x384xf32>
    %7 = arith.addf %2, %6 : vector<16x384xf32>
    %c1 = arith.constant 1 : index
    %c0_6 = arith.constant 0 : index
    %c0_7 = arith.constant 0 : index
    %8 = vector.load %arg2[%c1, %c0_6, %c0_7] : memref<9x16x4xbf16, #tpu.memory_space<vmem>>, vector<1x16x4xbf16>
    %9 = vector.shape_cast %8 : vector<1x16x4xbf16> to vector<16x4xbf16>
    %10 = vector.extract_strided_slice %1 {offsets = [0, 1], sizes = [4, 384], strides = [1, 1]} : vector<4x512xbf16> to vector<4x384xbf16>
    %cst_8 = arith.constant dense<0.000000e+00> : vector<16x384xf32>
    %11 = tpu.matmul %9, %10, %cst_8 {dimension_numbers = #tpu.dot_dimension_numbers<[1], [0], [0], [1], [0, 0, 1, 1], [], []>} : vector<16x4xbf16>, vector<4x384xbf16>, vector<16x384xf32> -> vector<16x384xf32>
    %12 = arith.addf %7, %11 : vector<16x384xf32>
    %c2 = arith.constant 2 : index
    %c0_9 = arith.constant 0 : index
    %c0_10 = arith.constant 0 : index
    %13 = vector.load %arg2[%c2, %c0_9, %c0_10] : memref<9x16x4xbf16, #tpu.memory_space<vmem>>, vector<1x16x4xbf16>
    %14 = vector.shape_cast %13 : vector<1x16x4xbf16> to vector<16x4xbf16>
    %15 = vector.extract_strided_slice %1 {offsets = [0, 2], sizes = [4, 384], strides = [1, 1]} : vector<4x512xbf16> to vector<4x384xbf16>
    %cst_11 = arith.constant dense<0.000000e+00> : vector<16x384xf32>
    %16 = tpu.matmul %14, %15, %cst_11 {dimension_numbers = #tpu.dot_dimension_numbers<[1], [0], [0], [1], [0, 0, 1, 1], [], []>} : vector<16x4xbf16>, vector<4x384xbf16>, vector<16x384xf32> -> vector<16x384xf32>
    %17 = arith.addf %12, %16 : vector<16x384xf32>
    %c3 = arith.constant 3 : index
    %c0_12 = arith.constant 0 : index
    %c0_13 = arith.constant 0 : index
    %18 = vector.load %arg2[%c3, %c0_12, %c0_13] : memref<9x16x4xbf16, #tpu.memory_space<vmem>>, vector<1x16x4xbf16>
    %19 = vector.shape_cast %18 : vector<1x16x4xbf16> to vector<16x4xbf16>
    %20 = vector.extract_strided_slice %1 {offsets = [0, 18], sizes = [4, 384], strides = [1, 1]} : vector<4x512xbf16> to vector<4x384xbf16>
    %cst_14 = arith.constant dense<0.000000e+00> : vector<16x384xf32>
    %21 = tpu.matmul %19, %20, %cst_14 {dimension_numbers = #tpu.dot_dimension_numbers<[1], [0], [0], [1], [0, 0, 1, 1], [], []>} : vector<16x4xbf16>, vector<4x384xbf16>, vector<16x384xf32> -> vector<16x384xf32>
    %22 = arith.addf %17, %21 : vector<16x384xf32>
    %c4 = arith.constant 4 : index
    %c0_15 = arith.constant 0 : index
    %c0_16 = arith.constant 0 : index
    %23 = vector.load %arg2[%c4, %c0_15, %c0_16] : memref<9x16x4xbf16, #tpu.memory_space<vmem>>, vector<1x16x4xbf16>
    %24 = vector.shape_cast %23 : vector<1x16x4xbf16> to vector<16x4xbf16>
    %25 = vector.extract_strided_slice %1 {offsets = [0, 19], sizes = [4, 384], strides = [1, 1]} : vector<4x512xbf16> to vector<4x384xbf16>
    %cst_17 = arith.constant dense<0.000000e+00> : vector<16x384xf32>
    %26 = tpu.matmul %24, %25, %cst_17 {dimension_numbers = #tpu.dot_dimension_numbers<[1], [0], [0], [1], [0, 0, 1, 1], [], []>} : vector<16x4xbf16>, vector<4x384xbf16>, vector<16x384xf32> -> vector<16x384xf32>
    %27 = arith.addf %22, %26 : vector<16x384xf32>
    %c5 = arith.constant 5 : index
    %c0_18 = arith.constant 0 : index
    %c0_19 = arith.constant 0 : index
    %28 = vector.load %arg2[%c5, %c0_18, %c0_19] : memref<9x16x4xbf16, #tpu.memory_space<vmem>>, vector<1x16x4xbf16>
    %29 = vector.shape_cast %28 : vector<1x16x4xbf16> to vector<16x4xbf16>
    %30 = vector.extract_strided_slice %1 {offsets = [0, 20], sizes = [4, 384], strides = [1, 1]} : vector<4x512xbf16> to vector<4x384xbf16>
    %cst_20 = arith.constant dense<0.000000e+00> : vector<16x384xf32>
    %31 = tpu.matmul %29, %30, %cst_20 {dimension_numbers = #tpu.dot_dimension_numbers<[1], [0], [0], [1], [0, 0, 1, 1], [], []>} : vector<16x4xbf16>, vector<4x384xbf16>, vector<16x384xf32> -> vector<16x384xf32>
    %32 = arith.addf %27, %31 : vector<16x384xf32>
    %c6 = arith.constant 6 : index
    %c0_21 = arith.constant 0 : index
    %c0_22 = arith.constant 0 : index
    %33 = vector.load %arg2[%c6, %c0_21, %c0_22] : memref<9x16x4xbf16, #tpu.memory_space<vmem>>, vector<1x16x4xbf16>
    %34 = vector.shape_cast %33 : vector<1x16x4xbf16> to vector<16x4xbf16>
    %35 = vector.extract_strided_slice %1 {offsets = [0, 36], sizes = [4, 384], strides = [1, 1]} : vector<4x512xbf16> to vector<4x384xbf16>
    %cst_23 = arith.constant dense<0.000000e+00> : vector<16x384xf32>
    %36 = tpu.matmul %34, %35, %cst_23 {dimension_numbers = #tpu.dot_dimension_numbers<[1], [0], [0], [1], [0, 0, 1, 1], [], []>} : vector<16x4xbf16>, vector<4x384xbf16>, vector<16x384xf32> -> vector<16x384xf32>
    %37 = arith.addf %32, %36 : vector<16x384xf32>
    %c7 = arith.constant 7 : index
    %c0_24 = arith.constant 0 : index
    %c0_25 = arith.constant 0 : index
    %38 = vector.load %arg2[%c7, %c0_24, %c0_25] : memref<9x16x4xbf16, #tpu.memory_space<vmem>>, vector<1x16x4xbf16>
    %39 = vector.shape_cast %38 : vector<1x16x4xbf16> to vector<16x4xbf16>
    %40 = vector.extract_strided_slice %1 {offsets = [0, 37], sizes = [4, 384], strides = [1, 1]} : vector<4x512xbf16> to vector<4x384xbf16>
    %cst_26 = arith.constant dense<0.000000e+00> : vector<16x384xf32>
    %41 = tpu.matmul %39, %40, %cst_26 {dimension_numbers = #tpu.dot_dimension_numbers<[1], [0], [0], [1], [0, 0, 1, 1], [], []>} : vector<16x4xbf16>, vector<4x384xbf16>, vector<16x384xf32> -> vector<16x384xf32>
    %42 = arith.addf %37, %41 : vector<16x384xf32>
    %c8 = arith.constant 8 : index
    %c0_27 = arith.constant 0 : index
    %c0_28 = arith.constant 0 : index
    %43 = vector.load %arg2[%c8, %c0_27, %c0_28] : memref<9x16x4xbf16, #tpu.memory_space<vmem>>, vector<1x16x4xbf16>
    %44 = vector.shape_cast %43 : vector<1x16x4xbf16> to vector<16x4xbf16>
    %45 = vector.extract_strided_slice %1 {offsets = [0, 38], sizes = [4, 384], strides = [1, 1]} : vector<4x512xbf16> to vector<4x384xbf16>
    %cst_29 = arith.constant dense<0.000000e+00> : vector<16x384xf32>
    %46 = tpu.matmul %44, %45, %cst_29 {dimension_numbers = #tpu.dot_dimension_numbers<[1], [0], [0], [1], [0, 0, 1, 1], [], []>} : vector<16x4xbf16>, vector<4x384xbf16>, vector<16x384xf32> -> vector<16x384xf32>
    %47 = arith.addf %42, %46 : vector<16x384xf32>
    %c0_30 = arith.constant 0 : index
    %c0_31 = arith.constant 0 : index
    %48 = vector.load %arg3[%c0_30, %c0_31] : memref<16x1xf32, #tpu.memory_space<vmem>>, vector<16x1xf32>
    %49 = vector.broadcast %48 : vector<16x1xf32> to vector<16x384xf32>
    %50 = arith.addf %47, %49 : vector<16x384xf32>
    %51 = vector.extract_strided_slice %50 {offsets = [0, 0], sizes = [8, 384], strides = [1, 1]} : vector<16x384xf32> to vector<8x384xf32>
    %52 = vector.extract_strided_slice %50 {offsets = [8, 0], sizes = [8, 384], strides = [1, 1]} : vector<16x384xf32> to vector<8x384xf32>
    %cst_32 = arith.constant 0.000000e+00 : f32
    %53 = vector.broadcast %cst_32 : f32 to vector<8x384xf32>
    %54 = arith.cmpf ogt, %51, %53 : vector<8x384xf32>
    %cst_33 = arith.constant 0.000000e+00 : f32
    %55 = vector.broadcast %cst_33 : f32 to vector<8x384xf32>
    %56 = arith.minimumf %51, %55 : vector<8x384xf32>
    %57 = math.exp %56 : vector<8x384xf32>
    %cst_34 = arith.constant 1.000000e+00 : f32
    %58 = vector.broadcast %cst_34 : f32 to vector<8x384xf32>
    %59 = arith.subf %57, %58 : vector<8x384xf32>
    %60 = arith.select %54, %51, %59 : vector<8x384xi1>, vector<8x384xf32>
    %cst_35 = arith.constant 5.000000e-01 : f32
    %61 = vector.broadcast %cst_35 : f32 to vector<8x384xf32>
    %62 = arith.mulf %61, %52 : vector<8x384xf32>
    %63 = math.tanh %62 : vector<8x384xf32>
    %cst_36 = arith.constant 5.000000e-01 : f32
    %64 = vector.broadcast %cst_36 : f32 to vector<8x384xf32>
    %65 = arith.mulf %64, %63 : vector<8x384xf32>
    %cst_37 = arith.constant 5.000000e-01 : f32
    %66 = vector.broadcast %cst_37 : f32 to vector<8x384xf32>
    %67 = arith.addf %65, %66 : vector<8x384xf32>
    %68 = arith.mulf %60, %67 : vector<8x384xf32>
    %c0_38 = arith.constant 0 : index
    %c0_39 = arith.constant 0 : index
    %69 = vector.load %arg4[%c0_38, %c0_39] : memref<1x384xf32, #tpu.memory_space<vmem>>, vector<1x384xf32>
    %70 = vector.broadcast %69 : vector<1x384xf32> to vector<8x384xf32>
    %71 = arith.mulf %68, %70 : vector<8x384xf32>
    %cst_40 = arith.constant dense<0.000000e+00> : vector<8xf32>
    %72 = vector.multi_reduction <add>, %71, %cst_40 [1] : vector<8x384xf32> to vector<8xf32>
    %73 = vector.shape_cast %72 : vector<8xf32> to vector<8x1xf32>
    %cst_41 = arith.constant 3.906250e-03 : f32
    %74 = vector.broadcast %cst_41 : f32 to vector<8x1xf32>
    %75 = arith.mulf %73, %74 : vector<8x1xf32>
    %76 = arith.mulf %71, %71 : vector<8x384xf32>
    %cst_42 = arith.constant dense<0.000000e+00> : vector<8xf32>
    %77 = vector.multi_reduction <add>, %76, %cst_42 [1] : vector<8x384xf32> to vector<8xf32>
    %78 = vector.shape_cast %77 : vector<8xf32> to vector<8x1xf32>
    %cst_43 = arith.constant 3.906250e-03 : f32
    %79 = vector.broadcast %cst_43 : f32 to vector<8x1xf32>
    %80 = arith.mulf %78, %79 : vector<8x1xf32>
    %81 = arith.mulf %75, %75 : vector<8x1xf32>
    %82 = arith.subf %80, %81 : vector<8x1xf32>
    %cst_44 = arith.constant 0.000000e+00 : f32
    %83 = vector.broadcast %cst_44 : f32 to vector<8x1xf32>
    %84 = arith.maximumf %82, %83 : vector<8x1xf32>
    %85 = vector.broadcast %75 : vector<8x1xf32> to vector<8x384xf32>
    %86 = arith.subf %71, %85 : vector<8x384xf32>
    %cst_45 = arith.constant 9.99999974E-6 : f32
    %87 = vector.broadcast %cst_45 : f32 to vector<8x1xf32>
    %88 = arith.addf %84, %87 : vector<8x1xf32>
    %89 = math.rsqrt %88 : vector<8x1xf32>
    %90 = vector.broadcast %89 : vector<8x1xf32> to vector<8x384xf32>
    %91 = arith.mulf %86, %90 : vector<8x384xf32>
    %c0_46 = arith.constant 0 : index
    %c0_47 = arith.constant 0 : index
    %c0_48 = arith.constant 0 : index
    %92 = vector.load %arg5[%c0_46, %c0_47, %c0_48] : memref<1x8x384xf32, #tpu.memory_space<vmem>>, vector<1x8x384xf32>
    %93 = vector.shape_cast %92 : vector<1x8x384xf32> to vector<8x384xf32>
    %94 = vector.shape_cast %91 : vector<8x384xf32> to vector<1x8x384xf32>
    tpu.vector_store %arg5[%c0_46, %c0_47, %c0_48], %94 {strides = array<i32>} : memref<1x8x384xf32, #tpu.memory_space<vmem>>, vector<1x8x384xf32>,
    return
  }
  func.func @transform_0(%arg0: i32) -> (i32, i32, i32) {
    %c0_i32 = arith.constant 0 : i32
    %c0_i32_0 = arith.constant 0 : i32
    %c0_i32_1 = arith.constant 0 : i32
    return %arg0, %c0_i32, %c0_i32_0 : i32, i32, i32
  }
  func.func @transform_1(%arg0: i32) -> (i32, i32, i32) {
    %c0_i32 = arith.constant 0 : i32
    %c0_i32_0 = arith.constant 0 : i32
    %c0_i32_1 = arith.constant 0 : i32
    %c0_i32_2 = arith.constant 0 : i32
    return %c0_i32, %c0_i32_0, %c0_i32_1 : i32, i32, i32
  }
  func.func @transform_2(%arg0: i32) -> (i32, i32) {
    %c0_i32 = arith.constant 0 : i32
    %c0_i32_0 = arith.constant 0 : i32
    %c0_i32_1 = arith.constant 0 : i32
    return %c0_i32, %c0_i32_0 : i32, i32
  }
  func.func @transform_3(%arg0: i32) -> (i32, i32) {
    %c0_i32 = arith.constant 0 : i32
    %c0_i32_0 = arith.constant 0 : i32
    %c0_i32_1 = arith.constant 0 : i32
    return %c0_i32, %c0_i32_0 : i32, i32
  }
  func.func @transform_4(%arg0: i32) -> (i32, i32, i32) {
    %c0_i32 = arith.constant 0 : i32
    %c0_i32_0 = arith.constant 0 : i32
    %c0_i32_1 = arith.constant 0 : i32
    return %arg0, %c0_i32, %c0_i32_0 : i32, i32, i32
  }
}

</mosaic_0001>

<bundles_post_ra>
// kernel: tpu_custom_call.1
= control target key start
LH: loop header
LB: loop body
LE: loop exit
PB: predicated region body
PF: predicated region fallthrough
CT: control target
= control target key end

     0   :  { %9 = vsyncpa [#allocation3], 0  ;;  %s2088_s0 = inlined_call_operand.vmem [shape: bf16[2,4,512], index: 0, kind: input, shape index: {}]   ;;  %s2089_s1 = inlined_call_operand.vmem [shape: bf16[9,16,4], index: 1, kind: input, shape index: {}]   ;;  %s2090_s2 = inlined_call_operand.vmem [shape: f32[16,1], index: 2, kind: input, shape index: {}]   ;;  %s2091_s3 = inlined_call_operand.vmem [shape: f32[1,384], index: 3, kind: input, shape index: {}]   ;;  %s2092_s4 = inlined_call_operand.hbm [shape: f32[2,8,384], index: 4, kind: output, shape index: {}]  }
   0x1   :  { %11 = vsyncpa [#allocation3 + $0x1], 0  ;;  %s1813_s15 = smov 0   ;;  %s1815_s16 = smov 0  }
   0x2   :  { %s1817_s17 = smov 0   ;;  %s1819_s18 = smov 0  }
   0x3 LB: > { %s1834_s19 = sadd.s32 4294967295, %s1773_s18   ;;  %s1463_s20 = sadd.s32 4294967294, %s1773_s18   ;;  %s1773_s18 = sphi %s1819_s18, %s2098_s18   ;;  %s1769_s17 = sphi %s1817_s17, %s2097_s17   ;;  %s1765_s16 = sphi %s1815_s16, %s2096_s16   ;;  %s1761_s15 = sphi %s1813_s15, %s2095_s15  }
   0x4   : > { %s1838_s21 = sadd.s32 1, %s1773_s18   ;;  %s113_s22 = sadd.s32 1, %s1769_s17 }
   0x5   : > { %s110_s23 = ssub.s32 %s1773_s18, %s1838_s21  ;;  %p123_p0 = scmp.ne.s32.totalorder %s1769_s17, %s1765_s16 }
   0x6   : > { %p111_p1 = scmp.eq.s32.totalorder %s110_s23, 0  ;;  %p124_p2 = scmp.eq.s32.totalorder %s1834_s19, 1 }
   0x7   : > { %p129_p3 = scmp.ne.s32.totalorder %s1765_s16, %s1761_s15  ;;  %p130_p4 = scmp.eq.s32.totalorder %s1463_s20, 1 }
   0x8   : > { %s1849_s24 = scalar_select %p111_p1, %s1769_s17, %s113_s22  }
   0x9   : > { %p1851_p5 = por %p124_p2, %p123_p0  ;;  %p1855_p6 = por %p130_p4, %p129_p3 }
   0xa   : > { %p1466_p7 = scmp.ge.s32.totalorder %s1773_s18, 1  ;;  %p165_p8 = scmp.lt.s32.totalorder %s1773_s18, 3 }
   0xc   : > { %p166_p9 = pnand %p1466_p7, %p165_p8 }
   0xd   : > { %p191_p10 = scmp.lt.s32.totalorder (!%p166_p9), %s1834_s19, 1  ;;  %v213_v0 = vlaneseq (!%p166_p9)  ;;  %v1775_v1 = vmov (!%p166_p9), 1983009808   ;;  %v1776_v5 = vmov (!%p166_p9), 0   ;;  %v1777_v10 = vmov (!%p166_p9), 0.0   ;;  %s1778_s6 = smov (!%p166_p9), 127  }
   0xe   : > { %169 = sbr.rel (%p166_p9) target bundleno = 672 (0x2a0), region = 36  ;;  %v211_v2 = vunpack.c.l.s4 (!%p166_p9), %v1775_v1  ;;  %284 = vmatprep.mubr.bf16.mxu0 (!%p166_p9), %v1776_v5  ;;  %1685 = vset.pattern.permute.xlu0 (!%p166_p9), %v1776_v5  ;;  %vm1779_vm0 = vmmov (!%p166_p9), 0   ;;  %s1780_s7 = smov (!%p166_p9), 126   ;;  %v1291_v14 = vld [vmem:[%s2090_s2] sm:$0xff] (!%p166_p9)  ;;  %v1292_v15 = vld [vmem:[%s2090_s2 + $0x8] sm:$0xff] (!%p166_p9)  ;;  %vm234_vm1 = vcmask (!%p166_p9), 1039360  }
   0xf   : > { %v1863_v3 = vshrl.u32 (!%p166_p9), %v213_v0, 7  ;;  %1686 = vset.pattern.permute.xlu1 (!%p166_p9), %v1776_v5  ;;  %1546 = vmatprep.subr.bf16.mxu1 (!%p166_p9), %v1777_v10  ;;  %s1781_s8 = smov (!%p166_p9), 110   ;;  %s1782_s9 = smov (!%p166_p9), 109   ;;  %vm242_vm2 = vcmask (!%p166_p9), 1041408   ;;  %v1688_v23 = vld [vmem:[%s2089_s1 + $0x8] sm:$0xff] (!%p166_p9)   ;;  %vm238_vm3 = vcmask (!%p166_p9), 31744  }
  0x10   : > { %v212_v4 = vunpack.c.0.s8 (!%p166_p9), %v211_v2  ;;  %1548 = vmatprep.mubr.msk.bf16.mxu1 (!%p166_p9), %vm1779_vm0, %v1777_v10  ;;  %s1783_s10 = smov (!%p166_p9), 108   ;;  %s1784_s11 = smov (!%p166_p9), 92   ;;  %vm453_vm4 = vcmask (!%p166_p9), 1031168   ;;  %vm575_vm5 = vcmask (!%p166_p9), 900096   ;;  %v1689_v36 = vld [vmem:[%s2089_s1] sm:$0xff] (!%p166_p9)   ;;  %v1690_v48 = vld [vmem:[%s2089_s1 + $0x10] sm:$0xff] (!%p166_p9)  }
  0x11   : > { %s1785_s12 = smov (!%p166_p9), 91   ;;  %s1786_s13 = smov (!%p166_p9), 90   ;;  %vm697_vm6 = vcmask (!%p166_p9), 891904   ;;  %v1691_v57 = vld [vmem:[%s2089_s1 + $0x18] sm:$0xff] (!%p166_p9)   ;;  %vm819_vm7 = vcmask (!%p166_p9), 883712   ;;  %vm941_vm8 = vcmask (!%p166_p9), 752640  }
  0x12   : > { %v215_v6 = vsub.s32 (!%p166_p9), %v212_v4, %v1863_v3  ;;  %v1692_v4 = vld [vmem:[%s2089_s1 + $0x20] sm:$0xff] (!%p166_p9)   ;;  %vm1063_vm9 = vcmask (!%p166_p9), 744448   ;;  %vm1185_vm10 = vcmask (!%p166_p9), 736256   ;;  %s188_s30 = sand.u32 (!%p166_p9), 1, %s1765_s16  }
  0x15   : > { %s192_s27 = scalar_select %p191_p10, %s1834_s19, 1 }
  0x17   : > { %s1527_s28 = sshll.u32 %s192_s27, 3 }
  0x18   : > { %s195_s5 = scalar_lea.vmem %s2088_s0, %s1527_s28 }
  0x19   : > { %v197_v7 = vld [vmem:[%s195_s5] sm:$0xff]  ;;  %s1632_s5 = smul.u32 24, %s188_s30 }
  0x1a   : > { %v1872_v8 = vrot.slane %v197_v7, %v215_v6  ;;  %v209_v9 = vcombine.high %v197_v7, %v197_v7 }
  0x1c   : > { %226 = vrot.lane.b32.xlu0 %v1872_v8, %s1778_s6  ;;  %v1876_v11 = vrot.slane %v209_v9, %v215_v6  ;;  %v224_v12 = vcombine.high %v1872_v8, %v1872_v8  ;;  %v345_v25 = vsel %vm242_vm2, %v1872_v8, 0 }
  0x1e   : > { %230 = vrot.lane.b32.xlu1 %v1876_v11, %s1778_s6  ;;  %v225_v13 = vcombine.high %v1876_v11, %v1876_v11  ;;  %v351_v33 = vsel %vm242_vm2, %v1876_v11, 0 }
  0x20   : > { %228 = vrot.lane.b32.xlu0 %v224_v12, %s1778_s6 }
  0x22   : > { %445 = vrot.lane.b32.xlu1 %v1872_v8, %s1780_s7 }
  0x24   : > { %447 = vrot.lane.b32.xlu0 %v224_v12, %s1780_s7 }
  0x26   : > { %449 = vrot.lane.b32.xlu1 %v1876_v11, %s1780_s7 }
  0x28   : > { %232 = vrot.lane.b32.xlu0 %v225_v13, %s1778_s6  ;;  %s1633_s6 = smul.u32 384, %s1834_s19  ;;  %s1390_s19 = scalar_lea.sflag [#allocation3], %s188_s30 }
  0x2a   : > { %567 = vrot.lane.b32.xlu1 %v1872_v8, %s1781_s8 }
  0x2c   : > { %569 = vrot.lane.b32.xlu0 %v224_v12, %s1781_s8 }
  0x2e   : > { %571 = vrot.lane.b32.xlu1 %v1876_v11, %s1781_s8 }
  0x30   : > { %689 = vrot.lane.b32.xlu0 %v1872_v8, %s1782_s9 }
  0x32   : > { %691 = vrot.lane.b32.xlu1 %v224_v12, %s1782_s9 }
  0x34   : > { %693 = vrot.lane.b32.xlu0 %v1876_v11, %s1782_s9 }
  0x36   : > { %451 = vrot.lane.b32.xlu1 %v225_v13, %s1780_s7  ;;  %s190_s7 = scalar_lea.vmem [#allocation2], %s1632_s5 }
  0x38   : > { %573 = vrot.lane.b32.xlu0 %v225_v13, %s1781_s8  ;;  %s1404_s8 = sshll.u32 %s190_s7, 4  ;;  %s2048_s8 = int_to_ptr.vmem [resolvable:$true] %s1404_s8 }
  0x3a   : > { %811 = vrot.lane.b32.xlu1 %v1872_v8, %s1783_s10 }
  0x3c   : > { %813 = vrot.lane.b32.xlu0 %v224_v12, %s1783_s10 }
  0x3e   : > { %815 = vrot.lane.b32.xlu1 %v1876_v11, %s1783_s10 }
  0x40   : > { %695 = vrot.lane.b32.xlu0 %v225_v13, %s1782_s9 }
  0x42   : > { %933 = vrot.lane.b32.xlu1 %v1872_v8, %s1784_s11 }
  0x44   : > { %935 = vrot.lane.b32.xlu0 %v224_v12, %s1784_s11 }
  0x46   : > { %937 = vrot.lane.b32.xlu1 %v1876_v11, %s1784_s11 }
  0x48   : > { %817 = vrot.lane.b32.xlu0 %v225_v13, %s1783_s10 }
  0x4a   : > { %939 = vrot.lane.b32.xlu1 %v225_v13, %s1784_s11  ;;  %s2046_s11 = scalar_lea.hbm %s2092_s4, %s1633_s6 }
  0x4c   : > { %1055 = vrot.lane.b32.xlu0 %v1872_v8, %s1785_s12 }
  0x4e   : > { %1057 = vrot.lane.b32.xlu1 %v224_v12, %s1785_s12 }
  0x50   : > { %1059 = vrot.lane.b32.xlu0 %v1876_v11, %s1785_s12 }
  0x52   : > { %1061 = vrot.lane.b32.xlu1 %v225_v13, %s1785_s12  ;;  %s1711_s12 = scalar_lea.vmem %s2048_s8, 384 }
  0x53   : > { %p1712_p11 = scmp.ne.s32.totalorder %s2048_s8, %s1711_s12 }
  0x54   : > { %1177 = vrot.lane.b32.xlu0 %v1872_v8, %s1786_s13 }
  0x55   : > { %p1713_p12 = pnand %p1712_p11, %p1851_p5 }
  0x56   : > { %1179 = vrot.lane.b32.xlu1 %v224_v12, %s1786_s13 }
  0x57   : > { %p1714_p13 = pneg %p1713_p12 }
  0x58   : > { %1181 = vrot.lane.b32.xlu0 %v1876_v11, %s1786_s13 }
  0x5a   : > { %1183 = vrot.lane.b32.xlu1 %v225_v13, %s1786_s13  ;;  %v1693_v13 = vld [vmem:[%s2089_s1 + $0x28] sm:$0xff]   ;;  %s1787_s13 = smov [#allocation2]  }
  0x5b   : > { %s1715_s14 = sshll.u32 %s1787_s13, 4  ;;  %s1716_s14 = int_to_ptr.vmem [resolvable:$false] %s1715_s14 }
  0x5c   : > { %1295 = vperm.xlu0 %1685, %v1291_v14   ;;  %s1717_s20 = scalar_lea.vmem %s1716_s14, 768  ;;  %p1718_p0 = scmp.lt.s32.totalorder %s2048_s8, %s1716_s14 }
  0x5d   : > { %p1719_p1 = scmp.lt.s32.totalorder %s1717_s20, %s1711_s12 }
  0x5e   : > { %1300 = vperm.xlu1 %1686, %v1292_v15  }
  0x5f   : > { %p1720_p2 = por %p1719_p1, %p1718_p0 }
  0x61   : > { %p1721_p3 = pnand %p1720_p2, %p1714_p13 }
  0x8e   : > { %v227_v16 = vpop.permute.xlu0 %226 }
  0x90   : > { %v231_v17 = vpop.permute.xlu1 %230 }
  0x92   : > { %v229_v18 = vpop.permute.xlu0 %228 }
  0x93   : > { %v236_v19 = vsel %vm234_vm1, %v229_v18, %v231_v17  ;;  %v235_v20 = vsel %vm234_vm1, %v227_v16, %v229_v18 }
  0x94   : > { %1472 = vmatprep.subr.msk.bf16.mxu0 %vm242_vm2, %v236_v19  ;;  %v446_v21 = vpop.permute.xlu1 %445  ;;  %v244_v22 = vsel %vm242_vm2, %v235_v20, 0 }
  0x95   : > { %253 = vmatpush1.bf16.msra.mxu0 %v244_v22  ;;  %v1694_v22 = vld [vmem:[%s2089_s1 + $0x30] sm:$0xff]  }
  0x96   : > { %v448_v24 = vpop.permute.xlu0 %447  ;;  %1476 = vmatprep.subr.msk.bf16.mxu0 %vm242_vm2, %v224_v12 }
  0x97   : > { %v454_v34 = vsel %vm453_vm4, %v446_v21, %v448_v24 }
  0x98   : > { %1473 = vmatmul.mubr.msk.bf16.vlgmr.msra.gmra.mrb[0].mxu0 %vm238_vm3, %v1688_v23  ;;  %v450_v26 = vpop.permute.xlu1 %449  ;;  %v461_v37 = vsel %vm242_vm2, %v454_v34, 0 }
  0x99   : > { %v455_v27 = vsel %vm453_vm4, %v448_v24, %v450_v26  ;;  %354 = vmatpush1.bf16.msra.mxu0 %v345_v25  ;;  %385 = vmatprep.mubr.bf16.mxu0 %v1776_v5 }
  0x9a   : > { %v233_v28 = vpop.permute.xlu0 %232  ;;  %1482 = vmatprep.subr.msk.bf16.mxu0 %vm242_vm2, %v455_v27 }
  0x9b   : > { %v237_v29 = vsel %vm234_vm1, %v231_v17, %v233_v28 }
  0x9c   : > { %v568_v30 = vpop.permute.xlu1 %567  ;;  %v250_v31 = vsel %vm242_vm2, %v237_v29, 0 }
  0x9d   : > { %1547 = vmatpush3.bf16.msra.mxu1 %v250_v31 }
  0x9e   : > { %v570_v32 = vpop.permute.xlu0 %569  ;;  %1552 = vmatprep.subr.bf16.mxu1 %v1777_v10 }
  0x9f   : > { %v576_v46 = vsel %vm575_vm5, %v568_v30, %v570_v32  ;;  %v1695_v30 = vld [vmem:[%s2089_s1 + $0x38] sm:$0xff]  }
  0xa0   : > { %v572_v35 = vpop.permute.xlu1 %571  ;;  %1549 = vmatmul.mubr.msk.bf16.vlgmr.msra.gmra.mrb[0].mxu1 %vm238_vm3, %v1688_v23  ;;  %v583_v50 = vsel %vm242_vm2, %v576_v46, 0 }
  0xa1   : > { %1553 = vmatpush3.bf16.msra.mxu1 %v351_v33  ;;  %1554 = vmatprep.mubr.msk.bf16.mxu1 %vm1779_vm0, %v1777_v10  ;;  %v577_v39 = vsel %vm575_vm5, %v570_v32, %v572_v35  ;;  %v1696_v33 = vld [vmem:[%s2089_s1 + $0x40] sm:$0xff]  }
  0xa2   : > { %v690_v38 = vpop.permute.xlu0 %689  ;;  %1558 = vmatprep.subr.bf16.mxu1 %v1777_v10 }
  0xa4   : > { %1477 = vmatmul.mubr.msk.bf16.vlgmr.msra.gmra.mrb[0].mxu0 %vm238_vm3, %v1689_v36  ;;  %v692_v40 = vpop.permute.xlu1 %691 }
  0xa5   : > { %470 = vmatpush1.bf16.msra.mxu0 %v461_v37  ;;  %501 = vmatprep.mubr.bf16.mxu0 %v1776_v5  ;;  %v698_v61 = vsel %vm697_vm6, %v690_v38, %v692_v40 }
  0xa6   : > { %v694_v41 = vpop.permute.xlu0 %693  ;;  %1488 = vmatprep.subr.msk.bf16.mxu0 %vm242_vm2, %v577_v39  ;;  %v705_v63 = vsel %vm242_vm2, %v698_v61, 0 }
  0xa7   : > { %v699_v53 = vsel %vm697_vm6, %v692_v40, %v694_v41 }
  0xa8   : > { %v452_v42 = vpop.permute.xlu1 %451  ;;  %1555 = vmatmul.mubr.msk.bf16.vlgmr.msra.gmra.mrb[4].mxu1 %vm238_vm3, %v1689_v36 }
  0xa9   : > { %v456_v43 = vsel %vm453_vm4, %v450_v26, %v452_v42  ;;  %1560 = vmatprep.mubr.msk.bf16.mxu1 %vm1779_vm0, %v1777_v10 }
  0xaa   : > { %v467_v44 = vsel %vm242_vm2, %v456_v43, 0  ;;  %v574_v45 = vpop.permute.xlu0 %573 }
  0xab   : > { %1559 = vmatpush3.bf16.msra.mxu1 %v467_v44  ;;  %v578_v47 = vsel %vm575_vm5, %v572_v35, %v574_v45 }
  0xac   : > { %1564 = vmatprep.subr.bf16.mxu1 %v1777_v10  ;;  %v812_v49 = vpop.permute.xlu1 %811  ;;  %v589_v51 = vsel %vm242_vm2, %v578_v47, 0 }
  0xae   : > { %v814_v52 = vpop.permute.xlu0 %813 }
  0xaf   : > { %v820_v11 = vsel %vm819_vm7, %v812_v49, %v814_v52 }
  0xb0   : > { %1483 = vmatmul.mubr.msk.bf16.vlgmr.msra.gmra.mrb[0].mxu0 %vm238_vm3, %v1690_v48  ;;  %1561 = vmatmul.mubr.msk.bf16.vlgmr.msra.gmra.mrb[8].mxu1 %vm238_vm3, %v1690_v48  ;;  %v816_v54 = vpop.permute.xlu1 %815  ;;  %v827_v16 = vsel %vm242_vm2, %v820_v11, 0 }
  0xb1   : > { %592 = vmatpush1.bf16.msra.mxu0 %v583_v50  ;;  %1565 = vmatpush3.bf16.msra.mxu1 %v589_v51  ;;  %v821_v1 = vsel %vm819_vm7, %v814_v52, %v816_v54 }
  0xb2   : > { %1566 = vmatprep.mubr.msk.bf16.mxu1 %vm1779_vm0, %v1777_v10  ;;  %v696_v55 = vpop.permute.xlu0 %695  ;;  %623 = vmatprep.mubr.bf16.mxu0 %v1776_v5 }
  0xb3   : > { %v700_v56 = vsel %vm697_vm6, %v694_v41, %v696_v55  ;;  %1494 = vmatprep.subr.msk.bf16.mxu0 %vm242_vm2, %v699_v53  ;;  %1570 = vmatprep.subr.bf16.mxu1 %v1777_v10 }
  0xb4   : > { %v934_v58 = vpop.permute.xlu1 %933  ;;  %v711_v59 = vsel %vm242_vm2, %v700_v56, 0 }
  0xb6   : > { %v936_v60 = vpop.permute.xlu0 %935 }
  0xb7   : > { %v942_v24 = vsel %vm941_vm8, %v934_v58, %v936_v60 }
  0xb8   : > { %1567 = vmatmul.mubr.msk.bf16.vlgmr.msra.gmra.mrb[12].mxu1 %vm238_vm3, %v1691_v57  ;;  %v938_v62 = vpop.permute.xlu1 %937  ;;  %v949_v27 = vsel %vm242_vm2, %v942_v24, 0 }
  0xb9   : > { %1571 = vmatpush3.bf16.msra.mxu1 %v711_v59  ;;  %1572 = vmatprep.mubr.msk.bf16.mxu1 %vm1779_vm0, %v1777_v10  ;;  %v943_v18 = vsel %vm941_vm8, %v936_v60, %v938_v62 }
  0xba   : > { %v818_v0 = vpop.permute.xlu0 %817  ;;  %1576 = vmatprep.subr.bf16.mxu1 %v1777_v10 }
  0xbb   : > { %v822_v2 = vsel %vm819_vm7, %v816_v54, %v818_v0 }
  0xbc   : > { %1489 = vmatmul.mubr.msk.bf16.vlgmr.msra.gmra.mrb[0].mxu0 %vm238_vm3, %v1691_v57  ;;  %v940_v6 = vpop.permute.xlu1 %939  ;;  %v833_v7 = vsel %vm242_vm2, %v822_v2, 0 }
  0xbd   : > { %714 = vmatpush1.bf16.msra.mxu0 %v705_v63  ;;  %745 = vmatprep.mubr.bf16.mxu0 %v1776_v5  ;;  %v944_v12 = vsel %vm941_vm8, %v938_v62, %v940_v6 }
  0xbe   : > { %1500 = vmatprep.subr.msk.bf16.mxu0 %vm242_vm2, %v821_v1  ;;  %v1056_v8 = vpop.permute.xlu0 %1055  ;;  %v955_v17 = vsel %vm242_vm2, %v944_v12, 0 }
  0xc0   : > { %1573 = vmatmul.mubr.msk.bf16.vlgmr.msra.gmra.mrb[16].mxu1 %vm238_vm3, %v1692_v4  ;;  %v1058_v9 = vpop.permute.xlu1 %1057 }
  0xc1   : > { %1577 = vmatpush3.bf16.msra.mxu1 %v833_v7  ;;  %1578 = vmatprep.mubr.msk.bf16.mxu1 %vm1779_vm0, %v1777_v10  ;;  %v1064_v32 = vsel %vm1063_vm9, %v1056_v8, %v1058_v9 }
  0xc2   : > { %1582 = vmatprep.subr.bf16.mxu1 %v1777_v10  ;;  %v1060_v15 = vpop.permute.xlu0 %1059  ;;  %v1071_v34 = vsel %vm242_vm2, %v1064_v32, 0 }
  0xc3   : > { %v1065_v28 = vsel %vm1063_vm9, %v1058_v9, %v1060_v15 }
  0xc4   : > { %v1062_v14 = vpop.permute.xlu1 %1061 }
  0xc5   : > { %v1066_v21 = vsel %vm1063_vm9, %v1060_v15, %v1062_v14 }
  0xc6   : > { %v1178_v20 = vpop.permute.xlu0 %1177  ;;  %v1077_v23 = vsel %vm242_vm2, %v1066_v21, 0 }
  0xc8   : > { %1495 = vmatmul.mubr.msk.bf16.vlgmr.msra.gmra.mrb[0].mxu0 %vm238_vm3, %v1692_v4  ;;  %1579 = vmatmul.mubr.msk.bf16.vlgmr.msra.gmra.mrb[20].mxu1 %vm238_vm3, %v1693_v13  ;;  %v1180_v19 = vpop.permute.xlu1 %1179 }
  0xc9   : > { %836 = vmatpush1.bf16.msra.mxu0 %v827_v16  ;;  %1583 = vmatpush3.bf16.msra.mxu1 %v955_v17 }
  0xca   : > { %1584 = vmatprep.mubr.msk.bf16.mxu1 %vm1779_vm0, %v1777_v10  ;;  %867 = vmatprep.mubr.bf16.mxu0 %v1776_v5  ;;  %v1182_v26 = vpop.permute.xlu0 %1181 }
  0xcb   : > { %1506 = vmatprep.subr.msk.bf16.mxu0 %vm242_vm2, %v943_v18  ;;  %1588 = vmatprep.subr.bf16.mxu1 %v1777_v10  ;;  %v1187_v35 = vsel %vm1185_vm10, %v1180_v19, %v1182_v26 }
  0xcc   : > { %v1184_v25 = vpop.permute.xlu1 %1183 }
  0xcd   : > { %v1188_v29 = vsel %vm1185_vm10, %v1182_v26, %v1184_v25 }
  0xce   : > { %v1199_v31 = vsel %vm242_vm2, %v1188_v29, 0 }
  0xd0   : > { %1585 = vmatmul.mubr.msk.bf16.vlgmr.msra.gmra.mrb[24].mxu1 %vm238_vm3, %v1694_v22 }
  0xd1   : > { %1589 = vmatpush3.bf16.msra.mxu1 %v1077_v23  ;;  %1590 = vmatprep.mubr.msk.bf16.mxu1 %vm1779_vm0, %v1777_v10 }
  0xd2   : > { %1594 = vmatprep.subr.bf16.mxu1 %v1777_v10 }
  0xd4   : > { %1501 = vmatmul.mubr.msk.bf16.vlgmr.msra.gmra.mrb[0].mxu0 %vm238_vm3, %v1693_v13 }
  0xd5   : > { %958 = vmatpush1.bf16.msra.mxu0 %v949_v27  ;;  %989 = vmatprep.mubr.bf16.mxu0 %v1776_v5 }
  0xd6   : > { %1512 = vmatprep.subr.msk.bf16.mxu0 %vm242_vm2, %v1065_v28 }
  0xd8   : > { %1591 = vmatmul.mubr.msk.bf16.vlgmr.msra.gmra.mrb[28].mxu1 %vm238_vm3, %v1695_v30 }
  0xd9   : > { %1595 = vmatpush3.bf16.msra.mxu1 %v1199_v31  ;;  %1596 = vmatprep.mubr.msk.bf16.mxu1 %vm1779_vm0, %v1777_v10  ;;  %v1186_v10 = vsel %vm1185_vm10, %v1178_v20, %v1180_v19 }
  0xda   : > { %v1193_v36 = vsel %vm242_vm2, %v1186_v10, 0 }
  0xdd   : > { %v1301_v26 = vpop.permute.xlu1 %1300 }
  0xe0   : > { %1507 = vmatmul.mubr.msk.bf16.vlgmr.msra.gmra.mrb[0].mxu0 %vm238_vm3, %v1694_v22  ;;  %1597 = vmatmul.mubr.msk.bf16.vlgmr.msra.gmra.mrb[32].mxu1 %vm238_vm3, %v1696_v33  ;;  %v1296_v22 = vpop.permute.xlu0 %1295 }
  0xe1   : > { %1080 = vmatpush1.bf16.msra.mxu0 %v1071_v34  ;;  %1111 = vmatprep.mubr.bf16.mxu0 %v1776_v5 }
  0xe2   : > { %1518 = vmatprep.subr.msk.bf16.mxu0 %vm242_vm2, %v1187_v35 }
  0xec   : > { %1513 = vmatmul.mubr.msk.bf16.vlgmr.msra.gmra.mrb[0].mxu0 %vm238_vm3, %v1695_v30 }
  0xed   : > { %1202 = vmatpush1.bf16.msra.mxu0 %v1193_v36  ;;  %1233 = vmatprep.mubr.bf16.mxu0 %v1776_v5 }
  0xf8   : > { %1519 = vmatmul.mubr.msk.bf16.vlgmr.msra.gmra.mrb[0].mxu0 %vm238_vm3, %v1696_v33 }
 0x173   : > { %v329_v37 = vpop.f32.mrb[0].mxu1 }
 0x174   : > { %v1550_v38 = vpop.f32.mrb[1].mxu1 }
 0x175   : > { %v332_v39 = vpop.f32.mrb[2].mxu1 }
 0x176   : > { %v1551_v40 = vpop.f32.mrb[3].mxu1 }
 0x17b   : > { %v430_v41 = vpop.f32.mrb[4].mxu1 }
 0x17c   : > { %v431_v42 = vadd.f32 %v430_v41, %v329_v37  ;;  %v1556_v43 = vpop.f32.mrb[5].mxu1 }
 0x17d   : > { %v433_v44 = vpop.f32.mrb[6].mxu1 }
 0x17e   : > { %v434_v45 = vadd.f32 %v433_v44, %v332_v39  ;;  %v1557_v46 = vpop.f32.mrb[7].mxu1 }
 0x183   : > { %v546_v47 = vpop.f32.mrb[8].mxu1 }
 0x184   : > { %v555_v48 = vadd.f32 %v546_v47, %v431_v42  ;;  %v1562_v49 = vpop.f32.mrb[9].mxu1 }
 0x185   : > { %v549_v50 = vpop.f32.mrb[10].mxu1 }
 0x186   : > { %v558_v51 = vadd.f32 %v549_v50, %v434_v45  ;;  %v1563_v52 = vpop.f32.mrb[11].mxu1 }
 0x18b   : > { %v668_v53 = vpop.f32.mrb[12].mxu1 }
 0x18c   : > { %v677_v5 = vadd.f32 %v668_v53, %v555_v48  ;;  %v1568_v54 = vpop.f32.mrb[13].mxu1 }
 0x18d   : > { %v671_v55 = vpop.f32.mrb[14].mxu1 }
 0x18e   : > { %v680_v56 = vadd.f32 %v671_v55, %v558_v51  ;;  %v1569_v57 = vpop.f32.mrb[15].mxu1 }
 0x193   : > { %v790_v58 = vpop.f32.mrb[16].mxu1 }
 0x194   : > { %v799_v59 = vadd.f32 %v790_v58, %v677_v5  ;;  %v1574_v60 = vpop.f32.mrb[17].mxu1 }
 0x195   : > { %v793_v61 = vpop.f32.mrb[18].mxu1  ;;  %v1354_v60 = vsub.s32 2, %v1863_v3 }
 0x196   : > { %v802_v62 = vadd.f32 %v793_v61, %v680_v56  ;;  %v1575_v63 = vpop.f32.mrb[19].mxu1  ;;  %v1346_v56 = vsub.s32 0, %v1863_v3 }
 0x197   : > { %v1342_v63 = vld [vmem:[%s2091_s3] sm:$0x7] }
 0x19b   : > { %v912_v0 = vpop.f32.mrb[20].mxu1 }
 0x19c   : > { %v921_v1 = vadd.f32 %v912_v0, %v799_v59  ;;  %v1580_v2 = vpop.f32.mrb[21].mxu1  ;;  %v1350_v59 = vsub.s32 1, %v1863_v3 }
 0x19d   : > { %v915_v4 = vpop.f32.mrb[22].mxu1 }
 0x19e   : > { %v924_v6 = vadd.f32 %v915_v4, %v802_v62  ;;  %v1581_v7 = vpop.f32.mrb[23].mxu1 }
 0x1a3   : > { %v1034_v8 = vpop.f32.mrb[24].mxu1 }
 0x1a4   : > { %v1043_v9 = vadd.f32 %v1034_v8, %v921_v1  ;;  %v1586_v11 = vpop.f32.mrb[25].mxu1  ;;  %v1351_v8 = vrot.slane %v1342_v63, %v1350_v59 }
 0x1a5   : > { %v1037_v12 = vpop.f32.mrb[26].mxu1 }
 0x1a6   : > { %v1046_v13 = vadd.f32 %v1037_v12, %v924_v6  ;;  %v1587_v14 = vpop.f32.mrb[27].mxu1  ;;  %v1347_v6 = vrot.slane %v1342_v63, %v1346_v56 }
 0x1ab   : > { %v1156_v15 = vpop.f32.mrb[28].mxu1 }
 0x1ac   : > { %v1165_v16 = vadd.f32 %v1156_v15, %v1043_v9  ;;  %v1592_v17 = vpop.f32.mrb[29].mxu1  ;;  %v1355_v9 = vrot.slane %v1342_v63, %v1354_v60 }
 0x1ad   : > { %v1159_v18 = vpop.f32.mrb[30].mxu1 }
 0x1ae   : > { %v1168_v19 = vadd.f32 %v1159_v18, %v1046_v13  ;;  %v1593_v20 = vpop.f32.mrb[31].mxu1 }
 0x1b3   : > { %v1278_v21 = vpop.f32.mrb[32].mxu1 }
 0x1b4   : > { %v1287_v23 = vadd.f32 %v1278_v21, %v1165_v16  ;;  %v1598_v24 = vpop.f32.mrb[33].mxu1 }
 0x1b5   : > { %v1281_v25 = vpop.f32.mrb[34].mxu1 }
 0x1b6   : > { %v1290_v27 = vadd.f32 %v1281_v25, %v1168_v19  ;;  %v1305_v28 = vadd.f32 %v1296_v22, %v1287_v23  ;;  %v1599_v29 = vpop.f32.mrb[35].mxu1 }
 0x1b8   : > { %v1314_v30 = vmin.f32 %v1305_v28, 0.0  ;;  %v1308_v31 = vadd.f32 %v1301_v26, %v1290_v27  ;;  %vm1311_vm11 = vcmp.gt.f32.partialorder %v1305_v28, 0.0 }
 0x1ba   : > { %v1319_v32 = vmul.f32 1.442695, %v1314_v30  ;;  %v1329_v33 = vmul.f32 0.5, %v1308_v31 }
 0x1bc   : > { %1697 = vpow2.f32 %v1319_v32 }
 0x1bd   : > { %1699 = vtanh.f32 %v1329_v33 }
 0x1c6   : > { %v1698_v34 = vpop.eup %1697 }
 0x1c7   : > { %v1700_v35 = vpop.eup %1699  ;;  %v1523_v10 = vadd.f32 -1.0, %v1698_v34 }
 0x1c8   : > { %v1335_v36 = vmul.f32 0.5, %v1700_v35 }
 0x1c9   : > { %v1326_v37 = vsel %vm1311_vm11, %v1305_v28, %v1523_v10 }
 0x1ca   : > { %v1338_v38 = vadd.f32 0.5, %v1335_v36 }
 0x1cb   : > { %v1235_v39 = vpop.f32.mrb[0].mxu0 }
 0x1cc   : > { %v1303_v40 = vadd.f32 %v1296_v22, %v1235_v39  ;;  %v1237_v41 = vpop.f32.mrb[1].mxu0  ;;  %v1341_v42 = vmul.f32 %v1338_v38, %v1326_v37 }
 0x1cd   : > { %v1304_v43 = vadd.f32 %v1296_v22, %v1237_v41  ;;  %v1239_v44 = vpop.f32.mrb[2].mxu0 }
 0x1ce   : > { %v1312_v45 = vmin.f32 %v1303_v40, 0.0  ;;  %v1306_v46 = vadd.f32 %v1301_v26, %v1239_v44  ;;  %v1241_v47 = vpop.f32.mrb[3].mxu0  ;;  %vm1309_vm12 = vcmp.gt.f32.partialorder %v1303_v40, 0.0  ;;  %v1361_v14 = vmul.f32 %v1355_v9, %v1341_v42 }
 0x1cf   : > { %v1313_v48 = vmin.f32 %v1304_v43, 0.0  ;;  %v1307_v49 = vadd.f32 %v1301_v26, %v1241_v47  ;;  %vm1310_vm13 = vcmp.gt.f32.partialorder %v1304_v43, 0.0 }
 0x1d0   : > { %v1315_v50 = vmul.f32 1.442695, %v1312_v45  ;;  %v1327_v51 = vmul.f32 0.5, %v1306_v46  ;;  %v1369_v19 = vmul.f32 %v1361_v14, %v1361_v14 }
 0x1d1   : > { %v1317_v52 = vmul.f32 1.442695, %v1313_v48  ;;  %v1328_v53 = vmul.f32 0.5, %v1307_v49 }
 0x1d2   : > { %1701 = vpow2.f32 %v1315_v50 }
 0x1d3   : > { %1703 = vpow2.f32 %v1317_v52 }
 0x1d4   : > { %1705 = vtanh.f32 %v1327_v51 }
 0x1d5   : > { %1707 = vtanh.f32 %v1328_v53 }
 0x1dc   : > { %v1702_v5 = vpop.eup %1701 }
 0x1dd   : > { %v1704_v54 = vpop.eup %1703  ;;  %v1521_v55 = vadd.f32 -1.0, %v1702_v5 }
 0x1de   : > { %v1706_v57 = vpop.eup %1705  ;;  %v1522_v58 = vadd.f32 -1.0, %v1704_v54 }
 0x1df   : > { %v1708_v61 = vpop.eup %1707  ;;  %v1333_v62 = vmul.f32 0.5, %v1706_v57  ;;  %v1324_v0 = vsel %vm1309_vm12, %v1303_v40, %v1521_v55 }
 0x1e0   : > { %v1334_v1 = vmul.f32 0.5, %v1708_v61  ;;  %v1325_v2 = vsel %vm1310_vm13, %v1304_v43, %v1522_v58 }
 0x1e1   : > { %v1336_v4 = vadd.f32 0.5, %v1333_v62 }
 0x1e2   : > { %v1337_v7 = vadd.f32 0.5, %v1334_v1 }
 0x1e3   : > { %v1339_v11 = vmul.f32 %v1336_v4, %v1324_v0 }
 0x1e4   : > { %v1340_v12 = vmul.f32 %v1337_v7, %v1325_v2 }
 0x1e5   : > { %v1359_v13 = vmul.f32 %v1347_v6, %v1339_v11 }
 0x1e6   : > { %v1360_v3 = vmul.f32 %v1351_v8, %v1340_v12 }
 0x1e7   : > { %v1367_v15 = vmul.f32 %v1359_v13, %v1359_v13 }
 0x1e8   : > { %v1362_v16 = vadd.f32 %v1360_v3, %v1359_v13  ;;  %v1368_v17 = vmul.f32 %v1360_v3, %v1360_v3 }
 0x1ea   : > { %v1363_v18 = vadd.f32 %v1362_v16, %v1361_v14  ;;  %v1370_v20 = vadd.f32 %v1368_v17, %v1367_v15 }
 0x1ec   : > { %1364 = vadd.xlane.f32.xlu1 %v1363_v18  ;;  %v1371_v21 = vadd.f32 %v1370_v20, %v1369_v19 }
 0x1ee   : > { %1372 = vadd.xlane.f32.xlu0 %v1371_v21 }
 0x279   : > { %v1365_v22 = vpop.xlane.xlu1 %1364 }
 0x27a   : > { %v1366_v23 = vmul.f32 0.00390625, %v1365_v22 }
 0x27b   : > { %v1373_v24 = vpop.xlane.xlu0 %1372 }
 0x27c   : > { %v1374_v25 = vmul.f32 0.00390625, %v1373_v24  ;;  %v1375_v26 = vmul.f32 %v1366_v23, %v1366_v23  ;;  %v1378_v30 = vsub.f32 %v1359_v13, %v1366_v23  ;;  %v1379_v31 = vsub.f32 %v1360_v3, %v1366_v23 }
 0x27d   : > { %v1380_v32 = vsub.f32 %v1361_v14, %v1366_v23 }
 0x27e   : > { %v1376_v27 = vsub.f32 %v1374_v25, %v1375_v26 }
 0x280   : > { %v1377_v28 = vmax.f32 %v1376_v27, 0.0 }
 0x282   : > { %v1381_v29 = vadd.f32 1e-05, %v1377_v28 }
 0x284   : > { %1709 = vrsqrt.f32 %v1381_v29 }
 0x28e   : > { %v1710_v33 = vpop.eup %1709 }
 0x28f   : > { %v1383_v34 = vmul.f32 %v1710_v33, %v1378_v30  ;;  %v1384_v35 = vmul.f32 %v1710_v33, %v1379_v31  ;;  %v1385_v10 = vmul.f32 %v1710_v33, %v1380_v32 }
 0x291   : > { %1386 = vst [vmem:[%s190_s7] sm:$0xff] %v1383_v34  ;;  %1387 = vst [vmem:[%s190_s7 + $0x8] sm:$0xff] %v1384_v35 }
 0x292   : > { %1388 = vst [vmem:[%s190_s7 + $0x10] sm:$0xff] %v1385_v10 }
 0x293   : > { %1724 = shalt.err (!%p1721_p3)
}
 0x294   : > { %s1725_s22 = scalar_lea.hbm %s2046_s11, 384  ;;  %s1729_s28 = scalar_lea.hbm %s2092_s4, 768 }
 0x295   : > { %p1726_p4 = scmp.ne.s32.totalorder %s2046_s11, %s1725_s22  ;;  %p1730_p9 = scmp.lt.u32.totalorder %s2046_s11, %s2092_s4 }
 0x296   : > { %p1731_p10 = scmp.lt.u32.totalorder %s1729_s28, %s1725_s22  ;;  %p1733_p12 = scmp.lt.u32.totalorder %s1725_s22, %s2046_s11 }
 0x297   : > { %p1727_p7 = pnand %p1726_p4, %p1851_p5 }
 0x298   : > { %p1732_p11 = por %p1731_p10, %p1730_p9 }
 0x299   : > { %p1728_p8 = pneg %p1727_p7 }
 0x29a   : > { %p1734_p13 = por %p1733_p12, %p1732_p11 }
 0x29c   : > { %p1735_p0 = pnand %p1734_p13, %p1728_p8 }
 0x29e   : > { %1738 = shalt.err (!%p1735_p0)
}
 0x29f   : > { %1634 = dma.vmem_to_hbm [thread:$0]  (%p1851_p5), %s2048_s8, 384, %s2046_s11, %s1390_s19  }
 0x2a0 PF: > { %p1640_p1 = scmp.ge.s32.totalorder %s1773_s18, 2  ;;  %s1416_s5 = sand.u32 1, %s1761_s15  }
 0x2a1   : > { %s1417_s6 = scalar_lea.sflag [#allocation3], %s1416_s5 }
 0x2a2   : > { %p1637_p2 = pnand %p1640_p1, %p1855_p6 }
 0x2a4   : > { %1756 = dma.done.wait (!%p1637_p2), %s1417_s6, 384  }
 0x2a5   : > { %1758 = vsyncadd (!%p1637_p2), %s1417_s6, 4294966912  ;;  %p14_p3 = scmp.ge.s32.totalorder %s1838_s21, 4   ;;  %s2095_s15 = smov %s1765_s16 }
 0x2a6   : > { %s2096_s16 = smov %s1769_s17  ;;  %s2097_s17 = smov %s1849_s24 }
 0x2a7   : > { %s2098_s18 = smov %s1838_s21  ;;  %16 = sbr.rel (!%p14_p3) target bundleno = 3 (0x3), region = 79 }
 0x2ae   :  { %1422 = vsyncpa [#allocation3], 1 }
 0x2af   :  { %1424 = vsyncpa [#allocation3 + $0x1], 1 }

</bundles_post_ra>
